<compile_context>
chip_gen: v5e
topology: v5e:2x2
jax: 0.10.0
libtpu: 0.0.40
codegen_flags: <defaults>
</compile_context>

<pallas_src>
import functools

import jax
import jax.numpy as jnp
from jax import lax
from jax.experimental import pallas as pl
from jax.experimental.pallas import tpu as pltpu


def _round_up(x, m):
    return (x + m - 1) // m * m


def _conv3x3_taps(v, w_ref, shifts, masks, fuse_taps):
    """3x3 'same' conv of v (C_pad, H*W) against w_ref (C_pad, 9*C_pad).

    Taps are produced with pltpu.roll along the flattened H*W lane axis and
    spatially-invalid positions are zeroed with the precomputed masks
    (== zero padding of the convolution).
    """
    cp, hw = v.shape
    taps = []
    acc = None
    for t, (d, mask) in enumerate(zip(shifts, masks)):
        # want tap[p] = v[p + d]  ->  roll toward higher indices by -d
        tap = v if d == 0 else pltpu.roll(v, shift=(-d) % hw, axis=1)
        if mask is not None:
            tap = jnp.where(mask, tap, 0.0)
        if fuse_taps:
            taps.append(tap)
        else:
            part = jnp.dot(w_ref[:, t * cp:(t + 1) * cp], tap,
                           preferred_element_type=jnp.float32)
            acc = part if acc is None else acc + part
    if fuse_taps:
        patches = jnp.concatenate(taps, axis=0)              # (9*C_pad, H*W)
        return jnp.dot(w_ref[...], patches, preferred_element_type=jnp.float32)
    return acc


def _rcu_kernel(x_ref, w1_ref, b1_ref, w2_ref, o_ref, *, height, width, fuse_taps):
    """One image per grid step.

    x_ref : (C_pad, H*W)     channels on sublanes, flattened spatial on lanes
    w*_ref: (C_pad, 9*C_pad) tap-major conv matrices (tap index = kh*3 + kw)
    b1_ref: (C_pad, 1)
    o_ref : (C_pad, H*W)
    """
    cp, hw = x_ref.shape

    x = x_ref[...]
    r = jnp.maximum(x, 0.0)                                  # relu(x)

    # Lane-position -> spatial-validity predicates; hoisted once, shared by
    # both convolutions and all taps.
    p = lax.broadcasted_iota(jnp.int32, (cp, hw), 1)
    if (width & (width - 1)) == 0:                           # power-of-two W
        col = jnp.bitwise_and(p, width - 1)
    else:
        col = lax.rem(p, width)
    top_ok = p >= width                                      # row-1 valid
    bot_ok = p < (height - 1) * width                        # row+1 valid
    lft_ok = col > 0                                         # col-1 valid
    rgt_ok = col < width - 1                                 # col+1 valid

    shifts, masks = [], []
    for sh in (-1, 0, 1):                                    # kh = sh + 1
        for sw in (-1, 0, 1):                                # kw = sw + 1
            shifts.append(sh * width + sw)
            m = None
            for cond, need in ((top_ok, sh == -1), (bot_ok, sh == 1),
                               (lft_ok, sw == -1), (rgt_ok, sw == 1)):
                if need:
                    m = cond if m is None else jnp.logical_and(m, cond)
            masks.append(m)

    h = _conv3x3_taps(r, w1_ref, shifts, masks, fuse_taps)   # conv1
    h = jnp.maximum(h + b1_ref[...], 0.0)                    # + bias, relu
    h = _conv3x3_taps(h, w2_ref, shifts, masks, fuse_taps)   # conv2 (no bias)

    o_ref[...] = (h + x).astype(o_ref.dtype)                 # residual add


def prepare_params(w1_oihw, b1, w2_oihw):
    """Init-time repack of torch-layout Conv2d params (kept out of the jitted
    per-step forward): OIHW -> (C_pad, 9*C_pad) tap-major matrices; channels
    zero-padded to a multiple of 8 so sublane tiles are aligned."""
    c = w1_oihw.shape[0]
    cp = max(8, _round_up(c, 8))

    def repack(w):
        w = jnp.pad(w, ((0, cp - c), (0, cp - c), (0, 0), (0, 0)))
        # (O, I, kh, kw) -> (O, kh, kw, I) -> (O, 9*I): column = (kh*3+kw)*C_pad + ci
        return jnp.transpose(w, (0, 2, 3, 1)).reshape(cp, 9 * cp)

    b1p = jnp.pad(b1, (0, cp - c)).reshape(cp, 1)
    return repack(w1_oihw), b1p, repack(w2_oihw)


@jax.jit
def residual_conv_unit(x_nchw, w1_mat, b1_col, w2_mat):
    """x_nchw: (N, C, H, W) float32; params from prepare_params()."""
    n, c, h, w = x_nchw.shape
    cp = w1_mat.shape[0]
    hw = h * w

    # NCHW stays NCHW: flatten H*W onto the lane axis (pure reshape, no
    # transpose); pad channels to the aligned count only when C % 8 != 0.
    x2d = x_nchw.reshape(n, c, hw)
    if cp != c:
        x2d = jnp.pad(x2d, ((0, 0), (0, cp - c), (0, 0)))

    # Small C: single fused im2col dot (contraction 9*C_pad).  Large C: per-tap
    # dots so the (9*C_pad, H*W) patch slab never has to live in VMEM.
    fuse_taps = cp < 128

    kernel = functools.partial(_rcu_kernel, height=h, width=w, fuse_taps=fuse_taps)
    out2d = pl.pallas_call(
        kernel,
        out_shape=jax.ShapeDtypeStruct((n, cp, hw), x_nchw.dtype),
        grid=(n,),
        in_specs=[
            pl.BlockSpec((None, cp, hw), lambda i: (i, 0, 0)),   # x: one image/step
            pl.BlockSpec((cp, 9 * cp), lambda i: (0, 0)),        # conv1 weights
            pl.BlockSpec((cp, 1), lambda i: (0, 0)),             # conv1 bias
            pl.BlockSpec((cp, 9 * cp), lambda i: (0, 0)),        # conv2 weights
        ],
        out_specs=pl.BlockSpec((None, cp, hw), lambda i: (i, 0, 0)),
        compiler_params=pltpu.CompilerParams(
            dimension_semantics=("parallel",),       # v7x: split images over 2 TCs
            vmem_limit_bytes=32 * 1024 * 1024,       # explicit; fits v5e/v6e/v7x
        ),
        input_output_aliases={0: 0},                 # reuse x's HBM buffer for out
    )(x2d, w1_mat, b1_col, w2_mat)

    return out2d[:, :c, :].reshape(n, c, h, w)


def _reference(x, w1, b1, w2):
    """Pure-JAX NCHW reference matching the PyTorch module."""
    out = jnp.maximum(x, 0.0)
    out = lax.conv_general_dilated(
        out, w1, window_strides=(1, 1), padding=((1, 1), (1, 1)),
        dimension_numbers=("NCHW", "OIHW", "NCHW")) + b1.reshape(1, -1, 1, 1)
    out = jnp.maximum(out, 0.0)
    out = lax.conv_general_dilated(
        out, w2, window_strides=(1, 1), padding=((1, 1), (1, 1)),
        dimension_numbers=("NCHW", "OIHW", "NCHW"))
    return out + x


if __name__ == "__main__":
    key = jax.random.PRNGKey(0)
    kx, kw1, kb1, kw2 = jax.random.split(key, 4)

    N, C, H, W = 2, 4, 16, 16                     # features = C = 4
    x = jax.random.normal(kx, (N, C, H, W), jnp.float32)

    # Torch Conv2d-style params: weight (C, C, 3, 3), bias (C,).
    bound = 1.0 / float(C * 3 * 3) ** 0.5
    w1 = jax.random.uniform(kw1, (C, C, 3, 3), jnp.float32, -bound, bound)
    b1 = jax.random.uniform(kb1, (C,), jnp.float32, -bound, bound)
    w2 = jax.random.uniform(kw2, (C, C, 3, 3), jnp.float32, -bound, bound)

    w1_mat, b1_col, w2_mat = prepare_params(w1, b1, w2)    # init-time repack
    out = residual_conv_unit(x, w1_mat, b1_col, w2_mat)
    out = jax.block_until_ready(out)

    ref = _reference(x, w1, b1, w2)
    assert out.shape == ref.shape and out.dtype == ref.dtype
    max_err = float(jnp.max(jnp.abs(out - ref)))
    if not (max_err < 1e-3):
        raise AssertionError(f"Pallas kernel mismatch vs reference: max abs err = {max_err}")

    print("KERNEL_OK")
</pallas_src>

<mosaic_0001>
module attributes {stable_mosaic.version = 11 : i64} {
  func.func @_rcu_kernel(%arg0: i32, %arg1: memref<1x8x256xf32, #tpu.memory_space<vmem>>, %arg2: memref<8x72xf32, #tpu.memory_space<vmem>>, %arg3: memref<8x1xf32, #tpu.memory_space<vmem>>, %arg4: memref<8x72xf32, #tpu.memory_space<vmem>>, %arg5: memref<1x8x256xf32, #tpu.memory_space<vmem>>) attributes {dimension_semantics = [#tpu.dimension_semantics<parallel>], iteration_bounds = array<i64: 2>, scalar_prefetch = 0 : i64, scratch_operands = 0 : i64, tpu.core_type = #tpu.core_type<tc>, window_params = [{transform_indices = @transform_0, window_bounds = array<i64: 1, 8, 256>}, {pipeline_mode = #tpu.pipeline_mode<synchronous>, transform_indices = @transform_1, window_bounds = array<i64: 8, 72>}, {pipeline_mode = #tpu.pipeline_mode<synchronous>, transform_indices = @transform_2, window_bounds = array<i64: 8, 1>}, {pipeline_mode = #tpu.pipeline_mode<synchronous>, transform_indices = @transform_3, window_bounds = array<i64: 8, 72>}, {transform_indices = @transform_4, window_bounds = array<i64: 1, 8, 256>}]} {
    %c0 = arith.constant 0 : index
    %c0_0 = arith.constant 0 : index
    %c0_1 = arith.constant 0 : index
    %0 = vector.load %arg1[%c0, %c0_0, %c0_1] : memref<1x8x256xf32, #tpu.memory_space<vmem>>, vector<1x8x256xf32>
    %1 = vector.shape_cast %0 : vector<1x8x256xf32> to vector<8x256xf32>
    %cst = arith.constant 0.000000e+00 : f32
    %2 = vector.broadcast %cst : f32 to vector<8x256xf32>
    %3 = arith.maximumf %1, %2 : vector<8x256xf32>
    %4 = tpu.iota {dimensions = array<i32: 1>} : vector<8x256xi32>
    %c15_i32 = arith.constant 15 : i32
    %5 = vector.broadcast %c15_i32 : i32 to vector<8x256xi32>
    %6 = arith.andi %4, %5 : vector<8x256xi32>
    %c16_i32 = arith.constant 16 : i32
    %7 = vector.broadcast %c16_i32 : i32 to vector<8x256xi32>
    %8 = arith.cmpi sge, %4, %7 : vector<8x256xi32>
    %c240_i32 = arith.constant 240 : i32
    %9 = vector.broadcast %c240_i32 : i32 to vector<8x256xi32>
    %10 = arith.cmpi slt, %4, %9 : vector<8x256xi32>
    %c0_i32 = arith.constant 0 : i32
    %11 = vector.broadcast %c0_i32 : i32 to vector<8x256xi32>
    %12 = arith.cmpi sgt, %6, %11 : vector<8x256xi32>
    %c15_i32_2 = arith.constant 15 : i32
    %13 = vector.broadcast %c15_i32_2 : i32 to vector<8x256xi32>
    %14 = arith.cmpi slt, %6, %13 : vector<8x256xi32>
    %15 = arith.andi %8, %12 : vector<8x256xi1>
    %16 = arith.andi %8, %14 : vector<8x256xi1>
    %17 = arith.andi %10, %12 : vector<8x256xi1>
    %18 = arith.andi %10, %14 : vector<8x256xi1>
    %c17_i32 = arith.constant 17 : i32
    %19 = tpu.dynamic_rotate %3 by %c17_i32 dim 1 : vector<8x256xf32>, i32 -> vector<8x256xf32>
    %cst_3 = arith.constant 0.000000e+00 : f32
    %20 = vector.broadcast %cst_3 : f32 to vector<8x256xf32>
    %21 = arith.select %15, %19, %20 : vector<8x256xi1>, vector<8x256xf32>
    %c16_i32_4 = arith.constant 16 : i32
    %22 = tpu.dynamic_rotate %3 by %c16_i32_4 dim 1 : vector<8x256xf32>, i32 -> vector<8x256xf32>
    %cst_5 = arith.constant 0.000000e+00 : f32
    %23 = vector.broadcast %cst_5 : f32 to vector<8x256xf32>
    %24 = arith.select %8, %22, %23 : vector<8x256xi1>, vector<8x256xf32>
    %c15_i32_6 = arith.constant 15 : i32
    %25 = tpu.dynamic_rotate %3 by %c15_i32_6 dim 1 : vector<8x256xf32>, i32 -> vector<8x256xf32>
    %cst_7 = arith.constant 0.000000e+00 : f32
    %26 = vector.broadcast %cst_7 : f32 to vector<8x256xf32>
    %27 = arith.select %16, %25, %26 : vector<8x256xi1>, vector<8x256xf32>
    %c1_i32 = arith.constant 1 : i32
    %28 = tpu.dynamic_rotate %3 by %c1_i32 dim 1 : vector<8x256xf32>, i32 -> vector<8x256xf32>
    %cst_8 = arith.constant 0.000000e+00 : f32
    %29 = vector.broadcast %cst_8 : f32 to vector<8x256xf32>
    %30 = arith.select %12, %28, %29 : vector<8x256xi1>, vector<8x256xf32>
    %c255_i32 = arith.constant 255 : i32
    %31 = tpu.dynamic_rotate %3 by %c255_i32 dim 1 : vector<8x256xf32>, i32 -> vector<8x256xf32>
    %cst_9 = arith.constant 0.000000e+00 : f32
    %32 = vector.broadcast %cst_9 : f32 to vector<8x256xf32>
    %33 = arith.select %14, %31, %32 : vector<8x256xi1>, vector<8x256xf32>
    %c241_i32 = arith.constant 241 : i32
    %34 = tpu.dynamic_rotate %3 by %c241_i32 dim 1 : vector<8x256xf32>, i32 -> vector<8x256xf32>
    %cst_10 = arith.constant 0.000000e+00 : f32
    %35 = vector.broadcast %cst_10 : f32 to vector<8x256xf32>
    %36 = arith.select %17, %34, %35 : vector<8x256xi1>, vector<8x256xf32>
    %c240_i32_11 = arith.constant 240 : i32
    %37 = tpu.dynamic_rotate %3 by %c240_i32_11 dim 1 : vector<8x256xf32>, i32 -> vector<8x256xf32>
    %cst_12 = arith.constant 0.000000e+00 : f32
    %38 = vector.broadcast %cst_12 : f32 to vector<8x256xf32>
    %39 = arith.select %10, %37, %38 : vector<8x256xi1>, vector<8x256xf32>
    %c239_i32 = arith.constant 239 : i32
    %40 = tpu.dynamic_rotate %3 by %c239_i32 dim 1 : vector<8x256xf32>, i32 -> vector<8x256xf32>
    %cst_13 = arith.constant 0.000000e+00 : f32
    %41 = vector.broadcast %cst_13 : f32 to vector<8x256xf32>
    %42 = arith.select %18, %40, %41 : vector<8x256xi1>, vector<8x256xf32>
    %43 = tpu.concatenate %21, %24, %27, %30, %3, %33, %36, %39, %42 in 0 : vector<8x256xf32>, vector<8x256xf32>, vector<8x256xf32>, vector<8x256xf32>, vector<8x256xf32>, vector<8x256xf32>, vector<8x256xf32>, vector<8x256xf32>, vector<8x256xf32> -> vector<72x256xf32>
    %c0_14 = arith.constant 0 : index
    %c0_15 = arith.constant 0 : index
    %44 = vector.load %arg2[%c0_14, %c0_15] : memref<8x72xf32, #tpu.memory_space<vmem>>, vector<8x72xf32>
    %cst_16 = arith.constant dense<0.000000e+00> : vector<8x256xf32>
    %45 = tpu.matmul %44, %43, %cst_16 {dimension_numbers = #tpu.dot_dimension_numbers<[1], [0], [0], [1], [0, 0, 1, 1], [], []>} : vector<8x72xf32>, vector<72x256xf32>, vector<8x256xf32> -> vector<8x256xf32>
    %c0_17 = arith.constant 0 : index
    %c0_18 = arith.constant 0 : index
    %46 = vector.load %arg3[%c0_17, %c0_18] : memref<8x1xf32, #tpu.memory_space<vmem>>, vector<8x1xf32>
    %47 = vector.broadcast %46 : vector<8x1xf32> to vector<8x256xf32>
    %48 = arith.addf %45, %47 : vector<8x256xf32>
    %cst_19 = arith.constant 0.000000e+00 : f32
    %49 = vector.broadcast %cst_19 : f32 to vector<8x256xf32>
    %50 = arith.maximumf %48, %49 : vector<8x256xf32>
    %c17_i32_20 = arith.constant 17 : i32
    %51 = tpu.dynamic_rotate %50 by %c17_i32_20 dim 1 : vector<8x256xf32>, i32 -> vector<8x256xf32>
    %cst_21 = arith.constant 0.000000e+00 : f32
    %52 = vector.broadcast %cst_21 : f32 to vector<8x256xf32>
    %53 = arith.select %15, %51, %52 : vector<8x256xi1>, vector<8x256xf32>
    %c16_i32_22 = arith.constant 16 : i32
    %54 = tpu.dynamic_rotate %50 by %c16_i32_22 dim 1 : vector<8x256xf32>, i32 -> vector<8x256xf32>
    %cst_23 = arith.constant 0.000000e+00 : f32
    %55 = vector.broadcast %cst_23 : f32 to vector<8x256xf32>
    %56 = arith.select %8, %54, %55 : vector<8x256xi1>, vector<8x256xf32>
    %c15_i32_24 = arith.constant 15 : i32
    %57 = tpu.dynamic_rotate %50 by %c15_i32_24 dim 1 : vector<8x256xf32>, i32 -> vector<8x256xf32>
    %cst_25 = arith.constant 0.000000e+00 : f32
    %58 = vector.broadcast %cst_25 : f32 to vector<8x256xf32>
    %59 = arith.select %16, %57, %58 : vector<8x256xi1>, vector<8x256xf32>
    %c1_i32_26 = arith.constant 1 : i32
    %60 = tpu.dynamic_rotate %50 by %c1_i32_26 dim 1 : vector<8x256xf32>, i32 -> vector<8x256xf32>
    %cst_27 = arith.constant 0.000000e+00 : f32
    %61 = vector.broadcast %cst_27 : f32 to vector<8x256xf32>
    %62 = arith.select %12, %60, %61 : vector<8x256xi1>, vector<8x256xf32>
    %c255_i32_28 = arith.constant 255 : i32
    %63 = tpu.dynamic_rotate %50 by %c255_i32_28 dim 1 : vector<8x256xf32>, i32 -> vector<8x256xf32>
    %cst_29 = arith.constant 0.000000e+00 : f32
    %64 = vector.broadcast %cst_29 : f32 to vector<8x256xf32>
    %65 = arith.select %14, %63, %64 : vector<8x256xi1>, vector<8x256xf32>
    %c241_i32_30 = arith.constant 241 : i32
    %66 = tpu.dynamic_rotate %50 by %c241_i32_30 dim 1 : vector<8x256xf32>, i32 -> vector<8x256xf32>
    %cst_31 = arith.constant 0.000000e+00 : f32
    %67 = vector.broadcast %cst_31 : f32 to vector<8x256xf32>
    %68 = arith.select %17, %66, %67 : vector<8x256xi1>, vector<8x256xf32>
    %c240_i32_32 = arith.constant 240 : i32
    %69 = tpu.dynamic_rotate %50 by %c240_i32_32 dim 1 : vector<8x256xf32>, i32 -> vector<8x256xf32>
    %cst_33 = arith.constant 0.000000e+00 : f32
    %70 = vector.broadcast %cst_33 : f32 to vector<8x256xf32>
    %71 = arith.select %10, %69, %70 : vector<8x256xi1>, vector<8x256xf32>
    %c239_i32_34 = arith.constant 239 : i32
    %72 = tpu.dynamic_rotate %50 by %c239_i32_34 dim 1 : vector<8x256xf32>, i32 -> vector<8x256xf32>
    %cst_35 = arith.constant 0.000000e+00 : f32
    %73 = vector.broadcast %cst_35 : f32 to vector<8x256xf32>
    %74 = arith.select %18, %72, %73 : vector<8x256xi1>, vector<8x256xf32>
    %75 = tpu.concatenate %53, %56, %59, %62, %50, %65, %68, %71, %74 in 0 : vector<8x256xf32>, vector<8x256xf32>, vector<8x256xf32>, vector<8x256xf32>, vector<8x256xf32>, vector<8x256xf32>, vector<8x256xf32>, vector<8x256xf32>, vector<8x256xf32> -> vector<72x256xf32>
    %c0_36 = arith.constant 0 : index
    %c0_37 = arith.constant 0 : index
    %76 = vector.load %arg4[%c0_36, %c0_37] : memref<8x72xf32, #tpu.memory_space<vmem>>, vector<8x72xf32>
    %cst_38 = arith.constant dense<0.000000e+00> : vector<8x256xf32>
    %77 = tpu.matmul %76, %75, %cst_38 {dimension_numbers = #tpu.dot_dimension_numbers<[1], [0], [0], [1], [0, 0, 1, 1], [], []>} : vector<8x72xf32>, vector<72x256xf32>, vector<8x256xf32> -> vector<8x256xf32>
    %78 = arith.addf %77, %1 : vector<8x256xf32>
    %c0_39 = arith.constant 0 : index
    %c0_40 = arith.constant 0 : index
    %c0_41 = arith.constant 0 : index
    %79 = vector.load %arg5[%c0_39, %c0_40, %c0_41] : memref<1x8x256xf32, #tpu.memory_space<vmem>>, vector<1x8x256xf32>
    %80 = vector.shape_cast %79 : vector<1x8x256xf32> to vector<8x256xf32>
    %81 = vector.shape_cast %78 : vector<8x256xf32> to vector<1x8x256xf32>
    tpu.vector_store %arg5[%c0_39, %c0_40, %c0_41], %81 {strides = array<i32>} : memref<1x8x256xf32, #tpu.memory_space<vmem>>, vector<1x8x256xf32>,
    return
  }
  func.func @transform_0(%arg0: i32) -> (i32, i32, i32) {
    %c0_i32 = arith.constant 0 : i32
    %c0_i32_0 = arith.constant 0 : i32
    %c0_i32_1 = arith.constant 0 : i32
    return %arg0, %c0_i32, %c0_i32_0 : i32, i32, i32
  }
  func.func @transform_1(%arg0: i32) -> (i32, i32) {
    %c0_i32 = arith.constant 0 : i32
    %c0_i32_0 = arith.constant 0 : i32
    %c0_i32_1 = arith.constant 0 : i32
    return %c0_i32, %c0_i32_0 : i32, i32
  }
  func.func @transform_2(%arg0: i32) -> (i32, i32) {
    %c0_i32 = arith.constant 0 : i32
    %c0_i32_0 = arith.constant 0 : i32
    %c0_i32_1 = arith.constant 0 : i32
    return %c0_i32, %c0_i32_0 : i32, i32
  }
  func.func @transform_3(%arg0: i32) -> (i32, i32) {
    %c0_i32 = arith.constant 0 : i32
    %c0_i32_0 = arith.constant 0 : i32
    %c0_i32_1 = arith.constant 0 : i32
    return %c0_i32, %c0_i32_0 : i32, i32
  }
  func.func @transform_4(%arg0: i32) -> (i32, i32, i32) {
    %c0_i32 = arith.constant 0 : i32
    %c0_i32_0 = arith.constant 0 : i32
    %c0_i32_1 = arith.constant 0 : i32
    return %arg0, %c0_i32, %c0_i32_0 : i32, i32, i32
  }
}

</mosaic_0001>

<bundles_post_ra>
// kernel: residual_conv_unit.1
= control target key start
LH: loop header
LB: loop body
LE: loop exit
PB: predicated region body
PF: predicated region fallthrough
CT: control target
= control target key end

     0   :  { %s619_s15 = smov 0   ;;  %s903_s0 = inlined_call_operand.vmem [shape: f32[2,8,256], index: 0, kind: input, shape index: {}, may-alias: {0,4}]   ;;  %s904_s1 = inlined_call_operand.vmem [shape: f32[8,72], index: 1, kind: input, shape index: {}]   ;;  %s905_s2 = inlined_call_operand.vmem [shape: f32[8,1], index: 2, kind: input, shape index: {}]   ;;  %s906_s3 = inlined_call_operand.vmem [shape: f32[8,72], index: 3, kind: input, shape index: {}]   ;;  %s907_s4 = inlined_call_operand.vmem [shape: f32[2,8,256], index: 4, kind: output, shape index: {}, may-alias: {0,4}]  }
   0x1 LB: > { %s513_s16 = sadd.s32 4294967295, %s583_s15   ;;  %p517_p0 = scmp.ge.s32.totalorder %s583_s15, 1  ;;  %s583_s15 = sphi %s619_s15, %s14_s15  }
   0x2   : > { %p162_p1 = scmp.lt.s32.totalorder %s583_s15, 3 }
   0x4   : > { %p163_p2 = pnand %p517_p0, %p162_p1 }
   0x5   : > { %p188_p3 = scmp.lt.s32.totalorder (!%p163_p2), %s513_s16, 1  ;;  %s585_s21 = smov (!%p163_p2), 112  }
   0x6   : > { %166 = sbr.rel (%p163_p2) target bundleno = 592 (0x250), region = 36  ;;  %s586_s22 = smov (!%p163_p2), 111  }
   0x7   : > { %s587_s23 = smov (!%p163_p2), 113   ;;  %s588_s24 = smov (!%p163_p2), 127  }
   0x8   : > { %s589_s25 = smov (!%p163_p2), 1   ;;  %s590_s26 = smov (!%p163_p2), 15  }
   0x9   : > { %s591_s27 = smov (!%p163_p2), 16   ;;  %s592_s28 = smov (!%p163_p2), 17  }
   0xb   : > { %s934_s16 = smov (!%p188_p3, %s513_s16), 1  ;;  %v202_v4 = vlaneseq  ;;  %v296_v26 = vld [vmem:[%s905_s2] sm:$0xff]  ;;  %v593_v29 = vmov 0  }
   0xc   : > { %s556_s17 = sshll.u32 %s934_s16, 4  ;;  %575 = vset.pattern.permute.xlu1 %v593_v29  ;;  %576 = vset.pattern.permute.xlu0 %v593_v29  ;;  %v295_v49 = vld [vmem:[%s904_s1] sm:$0xff] }
   0xd   : > { %s192_s20 = scalar_lea.vmem %s903_s0, %s556_s17  ;;  %v677_v5 = vand.u32 127, %v202_v4  ;;  %s197_s11 = scalar_lea.vmem %s907_s4, %s556_s17 }
   0xe   : > { %v635_v0 = vld [vmem:[%s192_s20] sm:$0xff]  ;;  %v644_v2 = vld [vmem:[%s192_s20 + $0x8] sm:$0xff] }
   0xf   : > { %v638_v1 = vmax.f32 %v635_v0, 0.0  ;;  %v649_v3 = vmax.f32 %v644_v2, 0.0  ;;  %v680_v7 = vadd.s32 128, %v677_v5  ;;  %v205_v11 = vand.u32 15, %v677_v5 }
  0x10   : > { %vm290_vm2 = vcmp.lt.s32.totalorder %v677_v5, 111  ;;  %vm281_vm5 = vcmp.lt.s32.totalorder %v677_v5, 112  ;;  %vm272_vm7 = vcmp.lt.s32.totalorder %v677_v5, 113  ;;  %vm263_vm10 = vcmp.lt.s32.totalorder %v677_v5, 127 }
  0x11   : > { %277 = vrot.lane.b32.xlu1 %v638_v1, %s585_s21  ;;  %286 = vrot.lane.b32.xlu0 %v638_v1, %s586_s22  ;;  %v206_v10 = vand.u32 15, %v680_v7  ;;  %vm210_vm0 = vcmp.lt.s32.totalorder %v680_v7, 240  ;;  %vm690_vm3 = vcmp.lt.s32.totalorder %v205_v11, 15  ;;  %vm720_vm8 = vcmp.gt.s32.totalorder %v205_v11, 0 }
  0x12   : > { %268 = vrot.lane.b32.xlu2 %v638_v1, %s587_s23  ;;  %vm909_vm11 = vcmp.lt.s32.totalorder %v677_v5, 1  ;;  %vm207_vm12 = vcmp.ge.s32.totalorder %v677_v5, 16  ;;  %vm908_vm13 = vcmp.lt.s32.totalorder %v677_v5, 15  ;;  %vm910_vm15 = vcmp.lt.s32.totalorder %v677_v5, 16 }
  0x13   : > { %vm685_vm1 = vcmp.lt.s32.totalorder %v206_v10, 15  ;;  %vm703_vm6 = vcmp.gt.s32.totalorder %v206_v10, 0  ;;  %vm767_vm14 = vmand %vm207_vm12, %vm690_vm3 }
  0x14   : > { %vm698_vm4 = vmand %vm210_vm0, %vm685_vm1 }
  0x15   : > { %vm728_vm9 = vmand %vm210_vm0, %vm703_vm6 }
  0x19   : > { %279 = vrot.lane.b32.xlu1 %v649_v3, %s585_s21  ;;  %288 = vrot.lane.b32.xlu0 %v649_v3, %s586_s22 }
  0x1a   : > { %270 = vrot.lane.b32.xlu2 %v649_v3, %s587_s23 }
  0x21   : > { %261 = vrot.lane.b32.xlu1 %v649_v3, %s588_s24  ;;  %259 = vrot.lane.b32.xlu0 %v638_v1, %s588_s24 }
  0x22   : > { %250 = vrot.lane.b32.xlu2 %v638_v1, %s589_s25 }
  0x29   : > { %241 = vrot.lane.b32.xlu1 %v638_v1, %s590_s26  ;;  %252 = vrot.lane.b32.xlu0 %v649_v3, %s589_s25 }
  0x2a   : > { %243 = vrot.lane.b32.xlu2 %v649_v3, %s590_s26 }
  0x31   : > { %234 = vrot.lane.b32.xlu1 %v649_v3, %s591_s27  ;;  %232 = vrot.lane.b32.xlu0 %v638_v1, %s591_s27 }
  0x32   : > { %223 = vrot.lane.b32.xlu2 %v638_v1, %s592_s28 }
  0x39   : > { %225 = vrot.lane.b32.xlu0 %v649_v3, %s592_s28  ;;  %299 = vperm.xlu1 %575, %v296_v26  }
  0x6c   : > { %v269_v6 = vpop.permute.xlu2 %268 }
  0x74   : > { %v271_v12 = vpop.permute.xlu2 %270 }
  0x75   : > { %v273_v27 = vsel %vm272_vm7, %v269_v6, %v271_v12  ;;  %v274_v28 = vsel %vm272_vm7, %v271_v12, %v269_v6 }
  0x7c   : > { %v251_v25 = vpop.permute.xlu2 %250 }
  0x83   : > { %v278_v8 = vpop.permute.xlu1 %277  ;;  %v287_v9 = vpop.permute.xlu0 %286 }
  0x84   : > { %v244_v34 = vpop.permute.xlu2 %243 }
  0x8b   : > { %v280_v16 = vpop.permute.xlu1 %279  ;;  %v289_v17 = vpop.permute.xlu0 %288 }
  0x8c   : > { %v291_v19 = vsel %vm290_vm2, %v287_v9, %v289_v17  ;;  %v292_v20 = vsel %vm290_vm2, %v289_v17, %v287_v9  ;;  %v282_v21 = vsel %vm281_vm5, %v278_v8, %v280_v16  ;;  %v283_v22 = vsel %vm281_vm5, %v280_v16, %v278_v8  ;;  %v224_v46 = vpop.permute.xlu2 %223 }
  0x8d   : > { %522 = vmatpush.msk.msra.mxu0 %vm690_vm3, %v291_v19  ;;  %530 = vmatpush.msk.msra.mxu1 %vm698_vm4, %v292_v20 }
  0x8f   : > { %314 = vmatpush.msra.mxu0 %v282_v21  ;;  %531 = vmatpush.msk.msra.mxu1 %vm210_vm0, %v283_v22 }
  0x91   : > { %523 = vmatpush.msk.msra.mxu0 %vm720_vm8, %v273_v27  ;;  %532 = vmatpush.msk.msra.mxu1 %vm728_vm9, %v274_v28 }
  0x93   : > { %v262_v30 = vpop.permute.xlu1 %261  ;;  %v260_v31 = vpop.permute.xlu0 %259 }
  0x94   : > { %v264_v32 = vsel %vm263_vm10, %v260_v31, %v262_v30  ;;  %v265_v33 = vsel %vm263_vm10, %v262_v30, %v260_v31  ;;  %v412_v30 = vld [vmem:[%s906_s3] sm:$0xff] }
  0x95   : > { %524 = vmatpush.msk.msra.mxu0 %vm690_vm3, %v264_v32  ;;  %533 = vmatpush.msk.msra.mxu1 %vm685_vm1, %v265_v33 }
  0x97   : > { %317 = vmatpush.msra.mxu0 %v638_v1  ;;  %337 = vmatpush.msra.mxu1 %v649_v3 }
  0x9b   : > { %v242_v35 = vpop.permute.xlu1 %241  ;;  %v253_v36 = vpop.permute.xlu0 %252 }
  0x9c   : > { %v256_v37 = vsel %vm909_vm11, %v253_v36, %v251_v25  ;;  %v255_v38 = vsel %vm909_vm11, %v251_v25, %v253_v36  ;;  %v247_v40 = vsel %vm908_vm13, %v244_v34, %v242_v35  ;;  %v246_v41 = vsel %vm908_vm13, %v242_v35, %v244_v34  ;;  %vm795_vm11 = vmand %vm207_vm12, %vm720_vm8 }
  0x9d   : > { %525 = vmatpush.msk.msra.mxu0 %vm720_vm8, %v256_v37  ;;  %534 = vmatpush.msk.msra.mxu1 %vm703_vm6, %v255_v38  ;;  %vm227_vm13 = vcmp.lt.s32.totalorder %v677_v5, 17 }
  0x9f   : > { %526 = vmatpush.msk.msra.mxu0 %vm767_vm14, %v247_v40  ;;  %535 = vmatpush.msk.msra.mxu1 %vm685_vm1, %v246_v41 }
  0xa3   : > { %v235_v42 = vpop.permute.xlu1 %234  ;;  %v233_v43 = vpop.permute.xlu0 %232 }
  0xa4   : > { %v238_v44 = vsel %vm910_vm15, %v235_v42, %v233_v43  ;;  %v237_v45 = vsel %vm910_vm15, %v233_v43, %v235_v42  ;;  %vm302_vm15 = vcmask 588800  }
  0xa5   : > { %527 = vmatpush.msk.msra.mxu0 %vm207_vm12, %v238_v44  ;;  %340 = vmatpush.msra.mxu1 %v237_v45 }
  0xab   : > { %v226_v48 = vpop.permute.xlu0 %225  ;;  %v300_v52 = vpop.permute.xlu1 %299 }
  0xac   : > { %v229_v50 = vsel %vm227_vm13, %v226_v48, %v224_v46  ;;  %v228_v51 = vsel %vm227_vm13, %v224_v46, %v226_v48 }
  0xad   : > { %528 = vmatpush.msk.msra.mxu0 %vm795_vm11, %v229_v50  ;;  %536 = vmatpush.msk.msra.mxu1 %vm703_vm6, %v228_v51 }
  0xae   : > { %529 = vmatmul.msk.f32.vlgmr.msra.gmra.mxu0 %vm302_vm15, %v295_v49  ;;  %537 = vmatmul.msk.f32.vlgmr.msra.gmra.mxu1 %vm302_vm15, %v295_v49 }
 0x12b   : > { %v323_v53 = vpop.f32.mrf.mxu0  ;;  %v343_v54 = vpop.f32.mrf.mxu1 }
 0x12c   : > { %v324_v55 = vadd.f32 %v323_v53, %v300_v52  ;;  %v344_v56 = vadd.f32 %v343_v54, %v300_v52 }
 0x12e   : > { %v346_v57 = vmax.f32 %v324_v55, 0.0  ;;  %v347_v58 = vmax.f32 %v344_v56, 0.0 }
 0x130   : > { %396 = vrot.lane.b32.xlu1 %v346_v57, %s585_s21  ;;  %404 = vrot.lane.b32.xlu2 %v346_v57, %s586_s22 }
 0x131   : > { %406 = vrot.lane.b32.xlu0 %v347_v58, %s586_s22 }
 0x138   : > { %390 = vrot.lane.b32.xlu1 %v347_v58, %s587_s23  ;;  %398 = vrot.lane.b32.xlu2 %v347_v58, %s585_s21 }
 0x139   : > { %388 = vrot.lane.b32.xlu0 %v346_v57, %s587_s23 }
 0x140   : > { %372 = vrot.lane.b32.xlu1 %v346_v57, %s589_s25  ;;  %380 = vrot.lane.b32.xlu2 %v346_v57, %s588_s24 }
 0x141   : > { %382 = vrot.lane.b32.xlu0 %v347_v58, %s588_s24 }
 0x148   : > { %366 = vrot.lane.b32.xlu1 %v347_v58, %s590_s26  ;;  %374 = vrot.lane.b32.xlu2 %v347_v58, %s589_s25 }
 0x149   : > { %364 = vrot.lane.b32.xlu0 %v346_v57, %s590_s26 }
 0x150   : > { %348 = vrot.lane.b32.xlu1 %v346_v57, %s592_s28  ;;  %356 = vrot.lane.b32.xlu2 %v346_v57, %s591_s27 }
 0x151   : > { %358 = vrot.lane.b32.xlu0 %v347_v58, %s591_s27 }
 0x158   : > { %350 = vrot.lane.b32.xlu2 %v347_v58, %s592_s28 }
 0x18a   : > { %v405_v59 = vpop.permute.xlu2 %404 }
 0x192   : > { %v399_v60 = vpop.permute.xlu2 %398 }
 0x19a   : > { %v381_v6 = vpop.permute.xlu2 %380 }
 0x1a2   : > { %v397_v61 = vpop.permute.xlu1 %396  ;;  %v375_v12 = vpop.permute.xlu2 %374 }
 0x1a3   : > { %v407_v62 = vpop.permute.xlu0 %406  ;;  %v400_v3 = vsel %vm281_vm5, %v397_v61, %v399_v60  ;;  %v401_v4 = vsel %vm281_vm5, %v399_v60, %v397_v61  ;;  %vm931_vm5 = vcmp.lt.s32.totalorder %v677_v5, 16 }
 0x1a4   : > { %v408_v63 = vsel %vm290_vm2, %v405_v59, %v407_v62  ;;  %v409_v1 = vsel %vm290_vm2, %v407_v62, %v405_v59 }
 0x1a5   : > { %538 = vmatpush.msk.msra.mxu2 %vm690_vm3, %v408_v63  ;;  %546 = vmatpush.msk.msra.mxu3 %vm698_vm4, %v409_v1 }
 0x1a7   : > { %424 = vmatpush.msra.mxu2 %v400_v3  ;;  %547 = vmatpush.msk.msra.mxu3 %vm210_vm0, %v401_v4  ;;  %vm927_vm0 = vcmp.lt.s32.totalorder %v677_v5, 1 }
 0x1a8   : > { %vm928_vm2 = vmmov %vm927_vm0 }
 0x1aa   : > { %v391_v8 = vpop.permute.xlu1 %390  ;;  %v357_v14 = vpop.permute.xlu2 %356 }
 0x1ab   : > { %v389_v9 = vpop.permute.xlu0 %388 }
 0x1ac   : > { %v392_v10 = vsel %vm272_vm7, %v389_v9, %v391_v8  ;;  %v393_v11 = vsel %vm272_vm7, %v391_v8, %v389_v9  ;;  %vm932_vm7 = vmmov %vm931_vm5 }
 0x1ad   : > { %539 = vmatpush.msk.msra.mxu2 %vm720_vm8, %v392_v10  ;;  %548 = vmatpush.msk.msra.mxu3 %vm728_vm9, %v393_v11 }
 0x1b2   : > { %v373_v15 = vpop.permute.xlu1 %372  ;;  %v351_v29 = vpop.permute.xlu2 %350 }
 0x1b3   : > { %v383_v16 = vpop.permute.xlu0 %382  ;;  %v377_v19 = vsel %vm927_vm0, %v375_v12, %v373_v15  ;;  %v376_v20 = vsel %vm928_vm2, %v373_v15, %v375_v12 }
 0x1b4   : > { %v384_v7 = vsel %vm263_vm10, %v381_v6, %v383_v16  ;;  %v385_v17 = vsel %vm263_vm10, %v383_v16, %v381_v6 }
 0x1b5   : > { %540 = vmatpush.msk.msra.mxu2 %vm690_vm3, %v384_v7  ;;  %549 = vmatpush.msk.msra.mxu3 %vm685_vm1, %v385_v17  ;;  %vm929_vm3 = vcmp.lt.s32.totalorder %v677_v5, 15 }
 0x1b6   : > { %vm930_vm4 = vmmov %vm929_vm3 }
 0x1b7   : > { %427 = vmatpush.msra.mxu2 %v346_v57  ;;  %447 = vmatpush.msra.mxu3 %v347_v58 }
 0x1b9   : > { %541 = vmatpush.msk.msra.mxu2 %vm720_vm8, %v377_v19  ;;  %550 = vmatpush.msk.msra.mxu3 %vm703_vm6, %v376_v20 }
 0x1ba   : > { %v367_v21 = vpop.permute.xlu1 %366 }
 0x1bb   : > { %v365_v22 = vpop.permute.xlu0 %364 }
 0x1bc   : > { %v369_v24 = vsel %vm929_vm3, %v367_v21, %v365_v22  ;;  %v368_v25 = vsel %vm930_vm4, %v365_v22, %v367_v21 }
 0x1bd   : > { %542 = vmatpush.msk.msra.mxu2 %vm767_vm14, %v369_v24  ;;  %551 = vmatpush.msk.msra.mxu3 %vm685_vm1, %v368_v25 }
 0x1c2   : > { %v349_v23 = vpop.permute.xlu1 %348 }
 0x1c3   : > { %v359_v26 = vpop.permute.xlu0 %358  ;;  %v353_v13 = vsel %vm227_vm13, %v351_v29, %v349_v23  ;;  %v352_v31 = vsel %vm227_vm13, %v349_v23, %v351_v29 }
 0x1c4   : > { %v361_v27 = vsel %vm931_vm5, %v359_v26, %v357_v14  ;;  %v360_v28 = vsel %vm932_vm7, %v357_v14, %v359_v26 }
 0x1c5   : > { %543 = vmatpush.msk.msra.mxu2 %vm207_vm12, %v361_v27  ;;  %450 = vmatpush.msra.mxu3 %v360_v28 }
 0x1c7   : > { %544 = vmatpush.msk.msra.mxu2 %vm795_vm11, %v353_v13  ;;  %552 = vmatpush.msk.msra.mxu3 %vm703_vm6, %v352_v31 }
 0x1c8   : > { %545 = vmatmul.msk.f32.vlgmr.msra.gmra.mxu2 %vm302_vm15, %v412_v30  ;;  %553 = vmatmul.msk.f32.vlgmr.msra.gmra.mxu3 %vm302_vm15, %v412_v30 }
 0x24b   : > { %v433_v32 = vpop.f32.mrf.mxu2  ;;  %v453_v33 = vpop.f32.mrf.mxu3 }
 0x24c   : > { %v434_v5 = vadd.f32 %v433_v32, %v635_v0  ;;  %v454_v34 = vadd.f32 %v453_v33, %v644_v2 }
 0x24e   : > { %456 = vst [vmem:[%s197_s11] sm:$0xff] %v434_v5 }
 0x24f   : > { %457 = vst [vmem:[%s197_s11 + $0x8] sm:$0xff] %v454_v34 }
 0x250 PF: > { %s14_s15 = sadd.s32 1, %s583_s15  }
 0x251   : > { %p11_p4 = scmp.ge.s32.totalorder %s14_s15, 4  }
 0x253   :  { %13 = sbr.rel (!%p11_p4) target bundleno = 1 (0x1), region = 66 }

</bundles_post_ra>
